<compile_context>
chip_gen: v7x
topology: tpu7x:2x2x1
jax: 0.10.0
libtpu: 0.0.40
codegen_flags: <defaults>
</compile_context>

<pallas_src>
import functools

import jax
import jax.numpy as jnp
from jax import lax
from jax.experimental import pallas as pl
from jax.experimental.pallas import tpu as pltpu


# ----------------------------------------------------------------------------
# Stage 1: fused f_key / f_value projection pre-pass (runs once over x).
# ----------------------------------------------------------------------------
def _project_kernel(x_ref, wkv_ref, bkv_ref, kq_ref, vx_ref, *, key_channels):
    # x_ref:   (1, C, TN) f32       wkv_ref: (Kc+Vc+1, C) f32
    # bkv_ref: (Kc+Vc+1, 1) f32
    # kq_ref:  (1, Kc, TN) bf16     vx_ref:  (1, Vc+1, TN) bf16
    Kc = key_channels
    proj = jnp.dot(wkv_ref[...], x_ref[0],
                   preferred_element_type=jnp.float32) + bkv_ref[...]
    # Key/query projection: BN folded into the conv, ReLU, Kc^{-1/4} scale
    # already folded into the weights/bias host-side.
    kq_ref[0] = jnp.maximum(proj[:Kc], 0.0).astype(jnp.bfloat16)
    # Value projection plus a constant ones row (zero weight row, bias 1),
    # used later to fold sum(p) into the ctx matmul for free.
    vx_ref[0] = proj[Kc:].astype(jnp.bfloat16)


def _project(x_flat, wkv, bkv, *, key_channels, value_channels, tn):
    B, C, N = x_flat.shape
    Kc, Vc = key_channels, value_channels
    full = lambda shape: pl.BlockSpec(shape, lambda b, t: (0,) * len(shape))
    return pl.pallas_call(
        functools.partial(_project_kernel, key_channels=Kc),
        out_shape=(jax.ShapeDtypeStruct((B, Kc, N), jnp.bfloat16),
                   jax.ShapeDtypeStruct((B, Vc + 1, N), jnp.bfloat16)),
        grid_spec=pltpu.PrefetchScalarGridSpec(
            num_scalar_prefetch=0,
            grid=(B, N // tn),
            in_specs=[
                pl.BlockSpec((1, C, tn), lambda b, t: (b, 0, t)),
                full((Kc + Vc + 1, C)),
                full((Kc + Vc + 1, 1)),
            ],
            out_specs=[
                pl.BlockSpec((1, Kc, tn), lambda b, t: (b, 0, t)),
                pl.BlockSpec((1, Vc + 1, tn), lambda b, t: (b, 0, t)),
            ],
        ),
        compiler_params=pltpu.CompilerParams(
            dimension_semantics=("parallel", "parallel"),
            vmem_limit_bytes=32 * 1024 * 1024,
        ),
    )(x_flat, wkv, bkv)


# ----------------------------------------------------------------------------
# Stage 2: flash-attention over the pre-projected K/Q and V(+ones) arrays.
# ----------------------------------------------------------------------------
def _attention_kernel(q_ref, k_ref, v_ref, ww_ref, bw_ref, o_ref,
                      m_sc, acc_sc, *, value_channels, softmax_in_bf16):
    # q_ref: (1, Kc, TQ)    bf16  query tile  (Kc^{-1/4} pre-scaled)
    # k_ref: (1, Kc, TKV)   bf16  key tile    (same array as q_ref)
    # v_ref: (1, Vc+1, TKV) bf16  value tile, last row = ones
    # ww_ref: (Oc, Vc) f32        bw_ref: (Oc, 1) f32
    # o_ref: (1, Oc, TQ) f32
    # m_sc:   (1, TQ) f32     running max (lane-dense)
    # acc_sc: (Vc+1, TQ) f32  fused [unnormalized ctx ; softmax denom l]
    Vc = value_channels
    kj = pl.program_id(2)

    @pl.when(kj == 0)
    def _init():
        m_sc[...] = jnp.full(m_sc.shape, -jnp.inf, m_sc.dtype)
        acc_sc[...] = jnp.zeros(acc_sc.shape, acc_sc.dtype)

    # sim[kv, q]: contract the shared Kc sublane dim of both operands (no .T
    # in source); bf16 MXU operands, f32 accumulation.  The (TKV, TQ)
    # orientation keeps every per-query quantity lane-dense and makes the kv
    # reductions sublane reductions.
    sim = lax.dot_general(
        k_ref[0], q_ref[0],
        dimension_numbers=(((0,), (0,)), ((), ())),
        preferred_element_type=jnp.float32)                        # (TKV, TQ)

    m_prev = m_sc[...]                                             # (1, TQ)
    m_new = jnp.maximum(m_prev, jnp.max(sim, axis=0, keepdims=True))
    alpha = jnp.exp(m_prev - m_new)                                # (1, TQ) f32
    if softmax_in_bf16:
        # v6e / v7x: bf16 EUP exp; p comes out directly in bf16 (no extra cast).
        p = jnp.exp((sim - m_new).astype(jnp.bfloat16))            # (TKV, TQ)
    else:
        # v5e: no bf16 VPU/EUP -> keep exp in f32, cast only for the MXU.
        p = jnp.exp(sim - m_new).astype(jnp.bfloat16)

    # ctx[:Vc] = V . p ; ctx[Vc] = sum_kv(p) via the ones row -- one MXU pass,
    # no separate XLU row-sum.
    ctx = jnp.dot(v_ref[0], p, preferred_element_type=jnp.float32)  # (Vc+1, TQ)
    acc_sc[...] = alpha * acc_sc[...] + ctx
    m_sc[...] = m_new

    @pl.when(kj == pl.num_programs(2) - 1)
    def _finalize():
        acc = acc_sc[...]                                          # (Vc+1, TQ)
        inv_l = pl.reciprocal(acc[Vc:, :], approx=True)            # EUP slot
        ctx_n = acc[:Vc, :] * inv_l                                # (Vc, TQ)
        out = jnp.dot(ww_ref[...], ctx_n,
                      preferred_element_type=jnp.float32) + bw_ref[...]
        o_ref[0] = out.astype(o_ref.dtype)                         # lane-dense


# ----------------------------------------------------------------------------
# Wrapper.
# ----------------------------------------------------------------------------
def _pick_tile(n, candidates):
    for t in candidates:
        if n % t == 0:
            return t
    return n  # full-extent block along this axis is always legal


def _valid_tile(t, n):
    return n % t == 0 and (t % 128 == 0 or t == n)


def _default_softmax_bf16():
    # bf16 VPU/EUP exists on v6e and newer; keep f32 elementwise softmax math
    # on v5e and older.  (Correct either way; this is a perf choice only.)
    try:
        kind = jax.devices()[0].device_kind.lower()
    except Exception:
        return False
    return not any(tag in kind for tag in ("v2", "v3", "v4", "v5"))


def base_attention_block(x, wk, bk, wv, bv, ww, bw, *, key_channels,
                         tq=None, tkv=None, softmax_in_bf16=None):
    """x: (B, C, W, H, D) f32.  Conv weights are (Cout, Cin); biases (Cout,).

    Returns (B, out_channels, W, H, D) f32."""
    B, C, W, H, D = x.shape
    N = W * H * D
    Kc, Cw = wk.shape
    assert Kc == key_channels and Cw == C
    Vc = wv.shape[0]
    Oc = ww.shape[0]

    if softmax_in_bf16 is None:
        softmax_in_bf16 = _default_softmax_bf16()

    # Channels on sublanes, flattened spatial N on lanes end-to-end: only free
    # reshapes on x / the output, no wrapper transposes.
    x_flat = x.reshape(B, C, N)

    # Split the 1/sqrt(Kc) similarity scale as Kc^{-1/4} on each side
    # (query == key) and fold it into the f_key conv (valid through ReLU since
    # the scale is positive), so the kernels never rescale per step.
    q_scale = float(key_channels) ** (-0.25)
    wk_s = wk * q_scale
    bk_s = bk * q_scale

    # Fused projection params: [f_key(BN folded, scaled) ; f_value ; ones row].
    wkv = jnp.concatenate(
        [wk_s, wv, jnp.zeros((1, C), wv.dtype)], axis=0)            # (Kc+Vc+1, C)
    bkv = jnp.concatenate(
        [bk_s, bv, jnp.ones((1,), bv.dtype)], axis=0)[:, None]      # (Kc+Vc+1, 1)
    bw2 = bw[:, None]                                               # (Oc, 1)

    # Tile sizes: large TKV to amortize ~0.35 us/step grid overhead, moderate
    # TQ so B*(N/TQ) keeps both v7x TensorCores busy.
    TQ = tq if tq is not None else _pick_tile(N, (256, 512, 128))
    TKV = tkv if tkv is not None else _pick_tile(N, (1024, 2048, 512, 256, 128))
    if tq is None and B * (N // TQ) < 2 and N % 256 == 0:
        TQ = N // 2   # keep the parallel grid extent >= 2 (two v7x TCs)
    assert _valid_tile(TQ, N), \
        f"tq={TQ} must divide N={N} and be a multiple of 128 (or equal N)"
    assert _valid_tile(TKV, N), \
        f"tkv={TKV} must divide N={N} and be a multiple of 128 (or equal N)"

    # Stage 1: projection pre-pass (hoisted out of the attention inner loop).
    kq, vx = _project(x_flat, wkv, bkv, key_channels=Kc, value_channels=Vc,
                      tn=TKV)

    # Stage 2: flash attention + W projection.
    kernel = functools.partial(_attention_kernel, value_channels=Vc,
                               softmax_in_bf16=softmax_in_bf16)
    full = lambda shape: pl.BlockSpec(shape, lambda b, qi, kj: (0,) * len(shape))

    out = pl.pallas_call(
        kernel,
        out_shape=jax.ShapeDtypeStruct((B, Oc, N), jnp.float32),
        grid_spec=pltpu.PrefetchScalarGridSpec(
            num_scalar_prefetch=0,
            grid=(B, N // TQ, N // TKV),
            in_specs=[
                pl.BlockSpec((1, Kc, TQ), lambda b, qi, kj: (b, 0, qi)),       # query tile
                pl.BlockSpec((1, Kc, TKV), lambda b, qi, kj: (b, 0, kj)),      # key tile
                pl.BlockSpec((1, Vc + 1, TKV), lambda b, qi, kj: (b, 0, kj)),  # value(+ones) tile
                full((Oc, Vc)),   # W conv weight
                full((Oc, 1)),    # W conv bias
            ],
            out_specs=pl.BlockSpec((1, Oc, TQ), lambda b, qi, kj: (b, 0, qi)),
            scratch_shapes=[
                pltpu.VMEM((1, TQ), jnp.float32),        # running max m
                pltpu.VMEM((Vc + 1, TQ), jnp.float32),   # [unnormalized ctx ; l]
            ],
        ),
        compiler_params=pltpu.CompilerParams(
            dimension_semantics=("parallel", "parallel", "arbitrary"),
            vmem_limit_bytes=32 * 1024 * 1024,  # safe on v5e/v6e/v7x at these tiles
        ),
    )(kq, kq, vx, ww, bw2)

    # (B, Oc, N) -> (B, Oc, W, H, D): pure reshape, matches torch permute+view+conv.
    return out.reshape(B, Oc, W, H, D)


def _reference_forward(x, wk, bk, wv, bv, ww, bw, *, key_channels):
    """Plain-JAX f32 reference of the PyTorch forward (scale=1), for validation."""
    B, C, W, H, D = x.shape
    N = W * H * D
    xf = x.reshape(B, C, N)
    kq = jnp.maximum(jnp.einsum('kc,bcn->bkn', wk, xf) + bk[None, :, None], 0.0)
    val = jnp.einsum('vc,bcn->bvn', wv, xf) + bv[None, :, None]
    sim = jnp.einsum('bkn,bkm->bnm', kq, kq) * key_channels ** (-0.5)
    p = jax.nn.softmax(sim, axis=-1)
    ctx = jnp.einsum('bnm,bvm->bvn', p, val)
    out = jnp.einsum('ov,bvn->bon', ww, ctx) + bw[None, :, None]
    return out.reshape(B, -1, W, H, D)


if __name__ == "__main__":
    # Small shapes consistent with the module.
    B, C = 2, 4            # batch, in_channels
    W, H, D = 8, 8, 8      # spatial (N = 512)
    Kc, Vc, Oc = 8, 8, 4   # key_channels, value_channels, out_channels

    key = jax.random.PRNGKey(0)
    ks = jax.random.split(key, 10)

    x = jax.random.normal(ks[0], (B, C, W, H, D), jnp.float32)

    # f_value conv: weight (Vc, C) == nn.Conv3d weight (Cout, Cin, 1,1,1).
    wv = 0.2 * jax.random.normal(ks[1], (Vc, C), jnp.float32)
    bv = 0.1 * jax.random.normal(ks[2], (Vc,), jnp.float32)

    # f_key conv + BatchNorm3d (inference mode, stats folded into the conv).
    wk_raw = 0.2 * jax.random.normal(ks[3], (Kc, C), jnp.float32)
    bk_raw = 0.1 * jax.random.normal(ks[4], (Kc,), jnp.float32)
    gamma = 1.0 + 0.1 * jax.random.normal(ks[5], (Kc,), jnp.float32)
    beta = 0.1 * jax.random.normal(ks[6], (Kc,), jnp.float32)
    run_mean = 0.1 * jax.random.normal(ks[7], (Kc,), jnp.float32)
    run_var = jnp.abs(1.0 + 0.1 * jax.random.normal(ks[8], (Kc,), jnp.float32))
    eps = 1e-5
    bn_scale = gamma / jnp.sqrt(run_var + eps)
    wk = wk_raw * bn_scale[:, None]
    bk = (bk_raw - run_mean) * bn_scale + beta

    # Module-faithful: W conv is zero-initialized -> output must be exactly 0.
    ww0 = jnp.zeros((Oc, Vc), jnp.float32)
    bw0 = jnp.zeros((Oc,), jnp.float32)
    out = jax.block_until_ready(
        base_attention_block(x, wk, bk, wv, bv, ww0, bw0, key_channels=Kc))
    ref = _reference_forward(x, wk, bk, wv, bv, ww0, bw0, key_channels=Kc)
    assert out.shape == (B, Oc, W, H, D)
    assert jnp.allclose(out, ref, atol=1e-6), "mismatch vs reference (zero-W)"

    # Non-zero output projection so the attention math is exercised end to end
    # (bf16 K/V storage + bf16 MXU operands -> loosened tolerance; see notes:
    # pl.reciprocal(approx=True) adds ~1e-3 relative error on the softmax norm).
    ww1 = 0.2 * jax.random.normal(ks[9], (Oc, Vc), jnp.float32)
    bw1 = jnp.full((Oc,), 0.05, jnp.float32)
    out1 = jax.block_until_ready(
        base_attention_block(x, wk, bk, wv, bv, ww1, bw1, key_channels=Kc))
    ref1 = _reference_forward(x, wk, bk, wv, bv, ww1, bw1, key_channels=Kc)
    max_err = float(jnp.max(jnp.abs(out1 - ref1)))
    assert jnp.allclose(out1, ref1, atol=2e-2, rtol=2e-2), \
        f"mismatch vs reference (max abs err {max_err})"

    # TODO(synk): scale>1 path (MaxPool3d + trilinear F.interpolate) not
    # implemented; the module default scale=1 never executes it.
    print("KERNEL_OK")
</pallas_src>

<mosaic_0001>
module attributes {stable_mosaic.version = 11 : i64} {
  func.func @_project_kernel(%arg0: i32, %arg1: i32, %arg2: memref<1x4x512xf32, #tpu.memory_space<vmem>>, %arg3: memref<17x4xf32, #tpu.memory_space<vmem>>, %arg4: memref<17x1xf32, #tpu.memory_space<vmem>>, %arg5: memref<1x8x512xbf16, #tpu.memory_space<vmem>>, %arg6: memref<1x9x512xbf16, #tpu.memory_space<vmem>>) attributes {dimension_semantics = [#tpu.dimension_semantics<parallel>, #tpu.dimension_semantics<parallel>], iteration_bounds = array<i64: 2, 1>, scalar_prefetch = 0 : i64, scratch_operands = 0 : i64, tpu.core_type = #tpu.core_type<tc>, window_params = [{transform_indices = @transform_0, window_bounds = array<i64: 1, 4, 512>}, {pipeline_mode = #tpu.pipeline_mode<synchronous>, transform_indices = @transform_1, window_bounds = array<i64: 17, 4>}, {pipeline_mode = #tpu.pipeline_mode<synchronous>, transform_indices = @transform_2, window_bounds = array<i64: 17, 1>}, {transform_indices = @transform_3, window_bounds = array<i64: 1, 8, 512>}, {transform_indices = @transform_4, window_bounds = array<i64: 1, 9, 512>}]} {
    %c0 = arith.constant 0 : index
    %c0_0 = arith.constant 0 : index
    %0 = vector.load %arg3[%c0, %c0_0] : memref<17x4xf32, #tpu.memory_space<vmem>>, vector<17x4xf32>
    %c0_1 = arith.constant 0 : index
    %c0_2 = arith.constant 0 : index
    %c0_3 = arith.constant 0 : index
    %1 = vector.load %arg2[%c0_1, %c0_2, %c0_3] : memref<1x4x512xf32, #tpu.memory_space<vmem>>, vector<1x4x512xf32>
    %2 = vector.shape_cast %1 : vector<1x4x512xf32> to vector<4x512xf32>
    %cst = arith.constant dense<0.000000e+00> : vector<17x512xf32>
    %3 = tpu.matmul %0, %2, %cst {dimension_numbers = #tpu.dot_dimension_numbers<[1], [0], [0], [1], [0, 0, 1, 1], [], []>} : vector<17x4xf32>, vector<4x512xf32>, vector<17x512xf32> -> vector<17x512xf32>
    %c0_4 = arith.constant 0 : index
    %c0_5 = arith.constant 0 : index
    %4 = vector.load %arg4[%c0_4, %c0_5] : memref<17x1xf32, #tpu.memory_space<vmem>>, vector<17x1xf32>
    %5 = vector.broadcast %4 : vector<17x1xf32> to vector<17x512xf32>
    %6 = arith.addf %3, %5 : vector<17x512xf32>
    %7 = vector.extract_strided_slice %6 {offsets = [0, 0], sizes = [8, 512], strides = [1, 1]} : vector<17x512xf32> to vector<8x512xf32>
    %cst_6 = arith.constant 0.000000e+00 : f32
    %8 = vector.broadcast %cst_6 : f32 to vector<8x512xf32>
    %9 = arith.maximumf %7, %8 : vector<8x512xf32>
    %10 = arith.truncf %9 : vector<8x512xf32> to vector<8x512xbf16>
    %c0_7 = arith.constant 0 : index
    %c0_8 = arith.constant 0 : index
    %c0_9 = arith.constant 0 : index
    %11 = vector.load %arg5[%c0_7, %c0_8, %c0_9] : memref<1x8x512xbf16, #tpu.memory_space<vmem>>, vector<1x8x512xbf16>
    %12 = vector.shape_cast %11 : vector<1x8x512xbf16> to vector<8x512xbf16>
    %13 = vector.shape_cast %10 : vector<8x512xbf16> to vector<1x8x512xbf16>
    tpu.vector_store %arg5[%c0_7, %c0_8, %c0_9], %13 {strides = array<i32>} : memref<1x8x512xbf16, #tpu.memory_space<vmem>>, vector<1x8x512xbf16>,
    %14 = vector.extract_strided_slice %6 {offsets = [8, 0], sizes = [9, 512], strides = [1, 1]} : vector<17x512xf32> to vector<9x512xf32>
    %15 = arith.truncf %14 : vector<9x512xf32> to vector<9x512xbf16>
    %c0_10 = arith.constant 0 : index
    %c0_11 = arith.constant 0 : index
    %c0_12 = arith.constant 0 : index
    %16 = vector.load %arg6[%c0_10, %c0_11, %c0_12] : memref<1x9x512xbf16, #tpu.memory_space<vmem>>, vector<1x9x512xbf16>
    %17 = vector.shape_cast %16 : vector<1x9x512xbf16> to vector<9x512xbf16>
    %18 = vector.shape_cast %15 : vector<9x512xbf16> to vector<1x9x512xbf16>
    tpu.vector_store %arg6[%c0_10, %c0_11, %c0_12], %18 {strides = array<i32>} : memref<1x9x512xbf16, #tpu.memory_space<vmem>>, vector<1x9x512xbf16>,
    return
  }
  func.func @transform_0(%arg0: i32, %arg1: i32) -> (i32, i32, i32) {
    %c0_i32 = arith.constant 0 : i32
    %c0_i32_0 = arith.constant 0 : i32
    return %arg0, %c0_i32, %arg1 : i32, i32, i32
  }
  func.func @transform_1(%arg0: i32, %arg1: i32) -> (i32, i32) {
    %c0_i32 = arith.constant 0 : i32
    %c0_i32_0 = arith.constant 0 : i32
    %c0_i32_1 = arith.constant 0 : i32
    return %c0_i32, %c0_i32_0 : i32, i32
  }
  func.func @transform_2(%arg0: i32, %arg1: i32) -> (i32, i32) {
    %c0_i32 = arith.constant 0 : i32
    %c0_i32_0 = arith.constant 0 : i32
    %c0_i32_1 = arith.constant 0 : i32
    return %c0_i32, %c0_i32_0 : i32, i32
  }
  func.func @transform_3(%arg0: i32, %arg1: i32) -> (i32, i32, i32) {
    %c0_i32 = arith.constant 0 : i32
    %c0_i32_0 = arith.constant 0 : i32
    return %arg0, %c0_i32, %arg1 : i32, i32, i32
  }
  func.func @transform_4(%arg0: i32, %arg1: i32) -> (i32, i32, i32) {
    %c0_i32 = arith.constant 0 : i32
    %c0_i32_0 = arith.constant 0 : i32
    return %arg0, %c0_i32, %arg1 : i32, i32, i32
  }
}

</mosaic_0001>

<bundles_post_ra>
// kernel: tpu_custom_call.1
= control target key start
LH: loop header
LB: loop body
LE: loop exit
PB: predicated region body
PF: predicated region fallthrough
CT: control target
= control target key end

     0   :  { %10 = vsyncpa [#allocation3], 0  ;;  %s1047_s0 = inlined_call_operand.vmem [shape: f32[2,4,512], index: 0, kind: input, shape index: {}]   ;;  %s1048_s1 = inlined_call_operand.vmem [shape: f32[17,4], index: 1, kind: input, shape index: {}]   ;;  %s1049_s2 = inlined_call_operand.vmem [shape: f32[17,1], index: 2, kind: input, shape index: {}]   ;;  %s1050_s3 = inlined_call_operand.hbm [shape: bf16[2,8,512], index: 3, kind: output, shape index: {0}]   ;;  %s1051_s4 = inlined_call_operand.vmem [shape: bf16[2,9,512], index: 4, kind: output, shape index: {1}]  }
   0x1   :  { %12 = vsyncpa [#allocation3 + $0x1], 0  ;;  %s876_s15 = smov 0   ;;  %s878_s16 = smov 0  }
   0x2   :  { %s880_s17 = smov 0   ;;  %s882_s18 = smov 0  }
   0x3   :  { %s884_s19 = smov 0   ;;  %s886_s20 = smov 0  }
   0x4 LB: > { %s667_s21 = sadd.s32 4294967295, %s846_s20   ;;  %s668_s22 = sadd.s32 4294967294, %s846_s20   ;;  %s846_s20 = sphi %s886_s20, %s18_s20   ;;  %s842_s19 = sphi %s884_s19, %s1062_s19   ;;  %s838_s18 = sphi %s882_s18, %s1061_s18   ;;  %s834_s17 = sphi %s880_s17, %s1060_s17   ;;  %s830_s16 = sphi %s878_s16, %s1059_s16   ;;  %s826_s15 = sphi %s876_s15, %s1058_s15  }
   0x5   : > { %s30_s23 = sadd.s32 1, %s842_s19  ;;  %s109_s24 = sadd.s32 1, %s834_s17 }
   0x6   : > { %p32_p0 = scmp.ge.s32.totalorder %s30_s23, 2  ;;  %p119_p1 = scmp.ne.s32.totalorder %s834_s17, %s830_s16 }
   0x7   : > { %p120_p2 = scmp.eq.s32.totalorder %s667_s21, 1  ;;  %p125_p3 = scmp.ne.s32.totalorder %s830_s16, %s826_s15 }
   0x8   : > { %s1064_s23 = smov (%p32_p0, %s30_s23), 0  ;;  %p126_p5 = scmp.eq.s32.totalorder %s668_s22, 1 }
   0x9   : > { %p916_p4 = por %p120_p2, %p119_p1  ;;  %s104_s26 = ssub.s32 %s842_s19, %s1064_s23 }
   0xa   : > { %p671_p6 = scmp.ge.s32.totalorder %s846_s20, 1  ;;  %p107_p7 = scmp.eq.s32.totalorder %s104_s26, 0 }
   0xb   : > { %p923_p8 = por %p126_p5, %p125_p3  ;;  %p191_p9 = scmp.lt.s32.totalorder %s846_s20, 3 }
   0xc   : > { %s929_s28 = scalar_select %p107_p7, %s834_s17, %s109_s24  }
   0xd   : > { %p192_p10 = pnand %p671_p6, %p191_p9 }
   0xe   : > { %p231_p11 = scmp.lt.s32.totalorder (!%p192_p10), %s838_s18, 1  ;;  %v848_v0 = vmov (!%p192_p10), 0.0   ;;  %v256_v1 = vld [vmem:[%s1049_s2] sm:$0xff] (!%p192_p10)  ;;  %v257_v2 = vld [vmem:[%s1049_s2 + $0x8] sm:$0xff] (!%p192_p10)  ;;  %v849_v3 = vmov (!%p192_p10), 0   ;;  %vm288_vm0 = vcmask (!%p192_p10), 1043456  }
   0xf   : > { %195 = sbr.rel (%p192_p10) target bundleno = 270 (0x10e), region = 32  ;;  %361 = vmatprep.mubr.f32.mxu0 (!%p192_p10), %v848_v0  ;;  %444 = vmatprep.mubr.f32.mxu1 (!%p192_p10), %v848_v0  ;;  %v258_v4 = vld [vmem:[%s1049_s2 + $0x10] sm:$0x1] (!%p192_p10)  ;;  %v251_v9 = vld [vmem:[%s1048_s1] sm:$0xff] (!%p192_p10)  ;;  %vm278_vm1 = vcmask (!%p192_p10), 31744   ;;  %v252_v10 = vld [vmem:[%s1048_s1 + $0x8] sm:$0xff] (!%p192_p10) }
  0x10   : > { %764 = vset.pattern.permute.xlu0 (!%p192_p10), %v849_v3  ;;  %765 = vset.pattern.permute.xlu1 (!%p192_p10), %v849_v3  ;;  %v253_v11 = vld [vmem:[%s1048_s1 + $0x10] sm:$0x1] (!%p192_p10)  ;;  %s216_s30 = sand.u32 (!%p192_p10), 1, %s830_s16   ;;  %vm511_vm2 = vcmask (!%p192_p10), 1040384   ;;  %vm512_vm3 = vsmask.f32 (!%p192_p10), 256 }
  0x11   : > { %261 = vperm.xlu0 (!%p192_p10), %764, %v256_v1   ;;  %266 = vperm.xlu1 (!%p192_p10), %765, %v257_v2   ;;  %s672_s5 = sshll.u32 (!%p192_p10), %s216_s30, 4  ;;  %vm514_vm4 = vcmask (!%p192_p10), 1044484   ;;  %vm515_vm5 = vsmask.f32 (!%p192_p10), 4352  ;;  %vm982_vm6 = vmand (!%p192_p10), %vm511_vm2, %vm512_vm3  ;;  %s525_s21 = scalar_lea.sflag (!%p192_p10), [#allocation3], %s216_s30 }
  0x12   : > { %s218_s9 = scalar_lea.vmem (!%p192_p10), [#allocation2], %s672_s5  ;;  %vm988_vm7 = vmand (!%p192_p10), %vm514_vm4, %vm515_vm5  ;;  %s850_s24 = smov (!%p192_p10), [#allocation2]  }
  0x13   : > { %s550_s10 = sshll.u32 (!%p192_p10), %s218_s9, 4  ;;  %s772_s26 = sshll.u32 (!%p192_p10), %s850_s24, 4  ;;  %s973_s10 = int_to_ptr.vmem [resolvable:$true] %s550_s10  ;;  %s773_s26 = int_to_ptr.vmem [resolvable:$false] %s772_s26 }
  0x14   : > { %s768_s22 = scalar_lea.vmem (!%p192_p10), %s973_s10, 256  ;;  %s774_s29 = scalar_lea.vmem (!%p192_p10), %s773_s26, 512 }
  0x15   : > { %271 = vperm.xlu0 (!%p192_p10), %764, %v258_v4   ;;  %p769_p12 = scmp.ne.s32.totalorder (!%p192_p10), %s973_s10, %s768_s22  ;;  %p775_p1 = scmp.lt.s32.totalorder (!%p192_p10), %s973_s10, %s773_s26 }
  0x16   : > { %s939_s7 = scalar_select %p231_p11, %s838_s18, 1 }
  0x17   : > { %p770_p13 = pnand %p769_p12, %p916_p4  ;;  %p776_p2 = scmp.lt.s32.totalorder %s774_s29, %s768_s22 }
  0x18   : > { %s698_s8 = sshll.u32 %s939_s7, 4  ;;  %s699_s6 = sshll.u32 %s939_s7, 5 }
  0x19   : > { %s238_s13 = scalar_lea.vmem %s1047_s0, %s698_s8  ;;  %s706_s8 = sshll.u32 %s838_s18, 8 }
  0x1a   : > { %v254_v5 = vld [vmem:[%s238_s13] sm:$0xff]  ;;  %v255_v6 = vld [vmem:[%s238_s13 + $0x8] sm:$0xff]  ;;  %s971_s18 = scalar_lea.hbm %s1050_s3, %s706_s8  ;;  %s978_s14 = scalar_lea.vmem %s1051_s4, %s699_s6 }
  0x1b   : > { %v276_v7 = vcombine.high %v254_v5, %v254_v5  ;;  %v277_v8 = vcombine.high %v255_v6, %v255_v6  ;;  %p771_p0 = pneg %p770_p13  ;;  %p777_p3 = por %p776_p2, %p775_p1 }
  0x1d   : > { %677 = vmatprep.subr.msk.mxu0 %vm288_vm0, %v276_v7  ;;  %682 = vmatprep.subr.msk.mxu1 %vm288_vm0, %v277_v8  ;;  %p778_p5 = pnand %p777_p3, %p771_p0 }
  0x1e   : > { %678 = vmatpush1.msk.msra.mxu0 %vm288_vm0, %v254_v5  ;;  %683 = vmatpush1.msk.msra.mxu1 %vm288_vm0, %v255_v6 }
  0x1f   : > { %679 = vmatmul.mubr.msk.f32.vlgmr.msra.gmra.mrb[0].mxu0 %vm278_vm1, %v251_v9  ;;  %684 = vmatmul.mubr.msk.f32.vlgmr.msra.gmra.mrb[0].mxu1 %vm278_vm1, %v251_v9 }
  0x20   : > { %367 = vmatprep.mubr.f32.mxu0 %v848_v0  ;;  %450 = vmatprep.mubr.f32.mxu1 %v848_v0 }
  0x23   : > { %680 = vmatmul.mubr.msk.f32.gmra.mrb[2].mxu0 %vm278_vm1, %v252_v10  ;;  %685 = vmatmul.mubr.msk.f32.gmra.mrb[2].mxu1 %vm278_vm1, %v252_v10 }
  0x24   : > { %373 = vmatprep.mubr.f32.mxu0 %v848_v0  ;;  %456 = vmatprep.mubr.f32.mxu1 %v848_v0 }
  0x27   : > { %681 = vmatmul.mubr.msk.f32.gmra.mrb[4].mxu0 %vm278_vm1, %v253_v11  ;;  %686 = vmatmul.mubr.msk.f32.gmra.mrb[4].mxu1 %vm278_vm1, %v253_v11 }
  0x90   : > { %v262_v12 = vpop.permute.xlu0 %261  ;;  %v267_v21 = vpop.permute.xlu1 %266 }
  0x94   : > { %v272_v36 = vpop.permute.xlu0 %271 }
  0xf2   : > { %v363_v13 = vpop.f32.mrb[0].mxu0  ;;  %v446_v14 = vpop.f32.mrb[0].mxu1 }
  0xf3   : > { %v364_v15 = vadd.f32 %v363_v13, %v262_v12  ;;  %v447_v16 = vadd.f32 %v446_v14, %v262_v12  ;;  %v365_v17 = vpop.f32.mrb[1].mxu0  ;;  %v448_v18 = vpop.f32.mrb[1].mxu1 }
  0xf4   : > { %v366_v19 = vadd.f32 %v365_v17, %v262_v12  ;;  %v449_v20 = vadd.f32 %v448_v18, %v262_v12 }
  0xf5   : > { %v463_v22 = vmax.f32 %v364_v15, 0.0  ;;  %v465_v23 = vmax.f32 %v447_v16, 0.0 }
  0xf6   : > { %v464_v24 = vmax.f32 %v366_v19, 0.0  ;;  %v466_v25 = vmax.f32 %v449_v20, 0.0  ;;  %v369_v26 = vpop.f32.mrb[2].mxu0  ;;  %v452_v27 = vpop.f32.mrb[2].mxu1 }
  0xf7   : > { %v370_v28 = vadd.f32 %v369_v26, %v267_v21  ;;  %v453_v29 = vadd.f32 %v452_v27, %v267_v21  ;;  %v371_v30 = vpop.f32.mrb[3].mxu0  ;;  %v454_v31 = vpop.f32.mrb[3].mxu1 }
  0xf8   : > { %v700_v32 = vpack.c.bf16 %v464_v24, %v463_v22  ;;  %v701_v33 = vpack.c.bf16 %v466_v25, %v465_v23  ;;  %v372_v34 = vadd.f32 %v371_v30, %v267_v21  ;;  %v455_v35 = vadd.f32 %v454_v31, %v267_v21 }
  0xfa   : > { %483 = vst [vmem:[%s218_s9] sm:$0xff] %v700_v32  ;;  %484 = vst [vmem:[%s218_s9 + $0x8] sm:$0xff] %v701_v33  ;;  %v702_v38 = vpack.c.bf16 %v372_v34, %v370_v28  ;;  %v703_v39 = vpack.c.bf16 %v455_v35, %v453_v29  ;;  %v375_v40 = vpop.f32.mrb[4].mxu0  ;;  %v458_v41 = vpop.f32.mrb[4].mxu1 }
  0xfb   : > { %v376_v43 = vadd.f32 %v375_v40, %v272_v36  ;;  %v459_v44 = vadd.f32 %v458_v41, %v272_v36  ;;  %v377_v45 = vpop.f32.mrb[5].mxu0  ;;  %v460_v46 = vpop.f32.mrb[5].mxu1 }
  0xfc   : > { %781 = shalt.err (!%p778_p5)
}
  0xfd   : > { %s782_s30 = scalar_lea.hbm %s971_s18, 256  ;;  %s786_s8 = scalar_lea.hbm %s1050_s3, 512 }
  0xfe   : > { %p783_p6 = scmp.ne.s32.totalorder %s971_s18, %s782_s30  ;;  %p787_p10 = scmp.lt.u32.totalorder %s971_s18, %s1050_s3 }
  0xff   : > { %p788_p11 = scmp.lt.u32.totalorder %s786_s8, %s782_s30  ;;  %p790_p13 = scmp.lt.u32.totalorder %s782_s30, %s971_s18 }
 0x100   : > { %p784_p7 = pnand %p783_p6, %p916_p4 }
 0x101   : > { %p789_p12 = por %p788_p11, %p787_p10 }
 0x102   : > { %p785_p9 = pneg %p784_p7 }
 0x103   : > { %p791_p0 = por %p790_p13, %p789_p12 }
 0x105   : > { %p792_p1 = pnand %p791_p0, %p785_p9 }
 0x107   : > { %795 = shalt.err (!%p792_p1)
}
 0x108   : > { %707 = dma.vmem_to_hbm [thread:$0]  (%p916_p4), %s973_s10, 256, %s971_s18, %s525_s21   ;;  %509 = vst [vmem:[%s978_s14] sm:$0xff] %v702_v38  ;;  %510 = vst [vmem:[%s978_s14 + $0x8] sm:$0xff] %v703_v39  ;;  %v378_v47 = vadd.f32 %v377_v45, %v272_v36  ;;  %v461_v48 = vadd.f32 %v460_v46, %v272_v36  ;;  %v518_v49 = vld [vmem:[%s978_s14 + $0x10] sm:$0x11]  ;;  %v521_v50 = vld [vmem:[%s978_s14 + $0x18] sm:$0x11] }
 0x109   : > { %vm517_vm8 = vmor %vm988_vm7, %vm982_vm6 }
 0x10a   : > { %v704_v51 = vpack.c.bf16 %v378_v47, %v376_v43  ;;  %v705_v52 = vpack.c.bf16 %v461_v48, %v459_v44 }
 0x10c   : > { %v519_v53 = vsel %vm517_vm8, %v704_v51, %v518_v49  ;;  %v522_v54 = vsel %vm517_vm8, %v705_v52, %v521_v50 }
 0x10d   : > { %520 = vst [vmem:[%s978_s14 + $0x10] sm:$0x11] %v519_v53  ;;  %523 = vst [vmem:[%s978_s14 + $0x18] sm:$0x11] %v522_v54 }
 0x10e PF: > { %p713_p4 = scmp.ge.s32.totalorder %s846_s20, 2  ;;  %s566_s25 = sand.u32 1, %s826_s15  }
 0x10f   : > { %s567_s10 = scalar_lea.sflag [#allocation3], %s566_s25 }
 0x110   : > { %p710_p2 = pnand %p713_p4, %p923_p8 }
 0x112   : > { %821 = dma.done.wait (!%p710_p2), %s567_s10, 256  }
 0x113   : > { %823 = vsyncadd (!%p710_p2), %s567_s10, 4294967040  ;;  %s18_s20 = sadd.s32 1, %s846_s20   ;;  %s1058_s15 = smov %s830_s16 }
 0x114   : > { %p15_p3 = scmp.ge.s32.totalorder %s18_s20, 4   ;;  %s1059_s16 = smov %s834_s17 }
 0x115   : > { %s1060_s17 = smov %s929_s28  ;;  %s1061_s18 = smov %s842_s19 }
 0x116   : > { %s1062_s19 = smov %s1064_s23  ;;  %17 = sbr.rel (!%p15_p3) target bundleno = 4 (0x4), region = 79 }
 0x11d   :  { %584 = vsyncpa [#allocation3], 1 }
 0x11e   :  { %586 = vsyncpa [#allocation3 + $0x1], 1 }

</bundles_post_ra>
